<compile_context>
chip_gen: v7x
topology: tpu7x:2x2x1
jax: 0.10.0
libtpu: 0.0.40
codegen_flags: <defaults>
</compile_context>

<pallas_src>
import functools

import numpy as np
import jax
import jax.numpy as jnp
from jax import lax
from jax.experimental import pallas as pl
from jax.experimental.pallas import tpu as pltpu


# ----------------------------------------------------------------------------
# Kernel 1: gating path (spatial-major)
#   s = sigmoid( wy @ relu( maxpool2(Wx*xl) + Wg*g + bg ) + by )
# x8_ref holds the 8 corners of every 2x2x2 pooling window stacked along the
# channel (sublane) axis: (1, 8*Fl, Pt).  w8 = blockdiag(wx x8) turns the
# "conv then pool" into a single matmul + 7 maxes.
# ----------------------------------------------------------------------------
def gate_kernel(x8_ref, g_ref, w8_ref, wg_ref, bg_ref, wy_ref, by_ref, s_ref):
    Fint = wg_ref.shape[0]
    # one matmul for all 8 corners: (8*Fint, 8*Fl) @ (8*Fl, Pt) -> (8*Fint, Pt)
    c = jnp.dot(w8_ref[...], x8_ref[0], preferred_element_type=jnp.float32)
    pooled = c[0:Fint]
    for k in range(1, 8):                      # maxpool(2) == max over the 8 corners
        pooled = jnp.maximum(pooled, c[k * Fint:(k + 1) * Fint])
    gg = jnp.dot(wg_ref[...], g_ref[0], preferred_element_type=jnp.float32) + bg_ref[...]
    r = jnp.maximum(pooled + gg, 0.0)                                   # (Fint, Pt)
    y = jnp.dot(wy_ref[...], r, preferred_element_type=jnp.float32) + by_ref[0, 0]
    s_ref[0] = 1.0 / (1.0 + jnp.exp(-y))                                # (1, Pt) lane-dense


def gate_call(x8, g2, w8, wg, bg, wy, by, p_tile):
    N, Fl8, P = x8.shape
    Fg = g2.shape[1]
    Fint8 = w8.shape[0]
    Fint = wg.shape[0]
    nT = P // p_tile
    return pl.pallas_call(
        gate_kernel,
        out_shape=jax.ShapeDtypeStruct((N, 1, P), jnp.float32),
        grid=(N, nT),
        in_specs=[
            pl.BlockSpec((1, Fl8, p_tile), lambda n, t: (n, 0, t)),
            pl.BlockSpec((1, Fg, p_tile), lambda n, t: (n, 0, t)),
            pl.BlockSpec((Fint8, Fl8), lambda n, t: (0, 0)),
            pl.BlockSpec((Fint, Fg), lambda n, t: (0, 0)),
            pl.BlockSpec((Fint, 1), lambda n, t: (0, 0)),
            pl.BlockSpec((1, Fint), lambda n, t: (0, 0)),
            pl.BlockSpec(memory_space=pltpu.MemorySpace.SMEM),   # scalar bias `by`
        ],
        out_specs=pl.BlockSpec((1, 1, p_tile), lambda n, t: (n, 0, t)),
        compiler_params=pltpu.CompilerParams(
            dimension_semantics=("parallel", "parallel")),
    )(x8, g2, w8, wg, bg, wy, by)


# ----------------------------------------------------------------------------
# Kernel 2: BN batch statistics of the gated activations (read-only pass)
#   att = up * xl ;  per-tile sum(att) and Gram = att @ att^T  (both tiny)
# ----------------------------------------------------------------------------
def stats_kernel(up_ref, xl_ref, sum_ref, gram_ref):
    att = up_ref[0] * xl_ref[0]                                         # (1,T)*(Fl,T)
    sum_ref[0, 0] = jnp.sum(att, axis=-1, keepdims=True)                # (Fl, 1)
    gram_ref[0, 0] = lax.dot_general(                                   # att @ att^T
        att, att, dimension_numbers=(((1,), (1,)), ((), ())),
        preferred_element_type=jnp.float32)                             # (Fl, Fl)


def stats_call(up, xl_flat, row_tile):
    N, Fl, DHW = xl_flat.shape
    nT = DHW // row_tile
    return pl.pallas_call(
        stats_kernel,
        out_shape=(jax.ShapeDtypeStruct((N, nT, Fl, 1), jnp.float32),
                   jax.ShapeDtypeStruct((N, nT, Fl, Fl), jnp.float32)),
        grid=(N, nT),
        in_specs=[
            pl.BlockSpec((1, 1, row_tile), lambda n, t: (n, 0, t)),
            pl.BlockSpec((1, Fl, row_tile), lambda n, t: (n, 0, t)),
        ],
        out_specs=(pl.BlockSpec((1, 1, Fl, 1), lambda n, t: (n, t, 0, 0)),
                   pl.BlockSpec((1, 1, Fl, Fl), lambda n, t: (n, t, 0, 0))),
        compiler_params=pltpu.CompilerParams(
            dimension_semantics=("parallel", "parallel")),
    )(up, xl_flat)


# ----------------------------------------------------------------------------
# Kernel 3: fused attention-multiply + out-conv + folded BatchNorm affine
#   out = (scale*Wout) @ (up * xl) + folded_bias      -- z never hits HBM
# ----------------------------------------------------------------------------
def out_kernel(up_ref, xl_ref, w_ref, b_ref, o_ref):
    att = up_ref[0] * xl_ref[0]                                         # (Fl, T)
    o_ref[0] = (jnp.dot(w_ref[...], att, preferred_element_type=jnp.float32)
                + b_ref[...])                                           # lane-dense store


def out_call(up, xl_flat, w_fold, b_fold, row_tile):
    N, Fl, DHW = xl_flat.shape
    nT = DHW // row_tile
    return pl.pallas_call(
        out_kernel,
        out_shape=jax.ShapeDtypeStruct((N, Fl, DHW), jnp.float32),
        grid=(N, nT),
        in_specs=[
            pl.BlockSpec((1, 1, row_tile), lambda n, t: (n, 0, t)),
            pl.BlockSpec((1, Fl, row_tile), lambda n, t: (n, 0, t)),
            pl.BlockSpec((Fl, Fl), lambda n, t: (0, 0)),
            pl.BlockSpec((Fl, 1), lambda n, t: (0, 0)),
        ],
        out_specs=pl.BlockSpec((1, Fl, row_tile), lambda n, t: (n, 0, t)),
        compiler_params=pltpu.CompilerParams(
            dimension_semantics=("parallel", "parallel")),
    )(up, xl_flat, w_fold, b_fold)


# ----------------------------------------------------------------------------
# Helpers
# ----------------------------------------------------------------------------
def _pick_tile(total, target):
    """Largest tile <= target that divides `total` and is a multiple of 128."""
    if total <= target or total % 128 != 0:
        return total
    t = (min(target, total) // 128) * 128
    while t >= 128:
        if total % t == 0:
            return t
        t -= 128
    return total


def _upsample_matrix_1d(in_size, out_size):
    """PyTorch trilinear (align_corners=False) interpolation weights, (out, in)."""
    U = np.zeros((out_size, in_size), dtype=np.float32)
    scale = in_size / out_size
    for o in range(out_size):
        src = max((o + 0.5) * scale - 0.5, 0.0)
        i0 = min(int(np.floor(src)), in_size - 1)
        i1 = min(i0 + 1, in_size - 1)
        lam = src - i0
        U[o, i0] += 1.0 - lam
        U[o, i1] += lam
    return U


# ----------------------------------------------------------------------------
# Full forward (wrapper). Params are stored conv-native: w[out_ch, in_ch].
# ----------------------------------------------------------------------------
def grid_attention_gate_local3d(xl_ncdhw, g_ncdhw, params, row_tile=2048, p_tile=2048):
    N, Fl, D, H, W = xl_ncdhw.shape
    _, Fg, Dh, Hh, Wh = g_ncdhw.shape
    P, DHW = Dh * Hh * Wh, D * H * W

    # Only transpose in the whole forward: corner-major layout for conv->maxpool.
    # x8[n, k*Fl+f, p] = xl[n, f, corner k of pooling window p]
    x8 = (xl_ncdhw.reshape(N, Fl, Dh, 2, Hh, 2, Wh, 2)
          .transpose(0, 3, 5, 7, 1, 2, 4, 6)
          .reshape(N, 8 * Fl, P))
    g2 = g_ncdhw.reshape(N, Fg, P)           # free reshape (native layout)
    xl_flat = xl_ncdhw.reshape(N, Fl, DHW)   # free reshape (native layout)

    # Block-diagonal Wx replica so conv on all 8 corners is one matmul.
    w8 = jnp.kron(jnp.eye(8, dtype=params["wx"].dtype), params["wx"])   # (8*Fint, 8*Fl)

    pt = _pick_tile(P, p_tile)
    s = gate_call(x8, g2, w8, params["wg"], params["bg"],
                  params["wy"], params["by"], pt)                       # (N, 1, P)

    # Separable trilinear upsample of the single-channel gate map (tiny; plain XLA
    # instead of a dense (DHW x P) matrix that would blow past VMEM).
    Ud = jnp.asarray(_upsample_matrix_1d(Dh, D))
    Uh = jnp.asarray(_upsample_matrix_1d(Hh, H))
    Uw = jnp.asarray(_upsample_matrix_1d(Wh, W))
    s_vol = s.reshape(N, Dh, Hh, Wh)
    up = jnp.einsum("nabc,da,hb,wc->ndhw", s_vol, Ud, Uh, Uw)
    up_flat = up.reshape(N, 1, DHW)

    rt = _pick_tile(DHW, row_tile)

    # Pass 1: batch statistics of att = up*xl (read-only over the big tensors).
    sums, grams = stats_call(up_flat, xl_flat, rt)

    # Fold BatchNorm3d (training-mode batch stats) into the out-conv weights.
    #   z = Wout @ att + bout ;  var(z) = diag(Wout Cov(att) Wout^T)
    wout, bout = params["wout"], params["bout"]
    cnt = N * DHW
    mean_a = jnp.sum(sums, axis=(0, 1)) / cnt                           # (Fl, 1)
    cov_a = jnp.sum(grams, axis=(0, 1)) / cnt - mean_a @ mean_a.T       # (Fl, Fl)
    # TODO(synk): E[aa^T]-mm^T can cancel at large |mean|/std; fine at these scales.
    mean_z = wout @ mean_a + bout                                       # (Fl, 1)
    var_z = jnp.sum((wout @ cov_a) * wout, axis=1, keepdims=True)       # (Fl, 1) biased
    scale = params["gamma"][:, None] * lax.rsqrt(var_z + 1e-5)          # (Fl, 1)
    w_fold = scale * wout                                               # diag(scale)@Wout
    b_fold = scale * bout + params["beta"][:, None] - scale * mean_z    # (Fl, 1)

    # Pass 2: fused attend + out-conv + BN affine, written in final layout.
    out = out_call(up_flat, xl_flat, w_fold, b_fold, rt)                # (N, Fl, DHW)
    return out.reshape(N, Fl, D, H, W)


# ----------------------------------------------------------------------------
# Pure-JAX reference (PyTorch semantics) for validation
# ----------------------------------------------------------------------------
def reference(xl, g, params, Ud, Uh, Uw):
    N, Fl, D, H, W = xl.shape
    _, Fg, Dh, Hh, Wh = g.shape
    Fint = params["wg"].shape[0]
    xc = jnp.einsum("ncdhw,fc->nfdhw", xl, params["wx"])
    pooled = xc.reshape(N, Fint, Dh, 2, Hh, 2, Wh, 2).max(axis=(3, 5, 7))
    gg = jnp.einsum("ncdhw,fc->nfdhw", g, params["wg"]) + params["bg"].reshape(1, Fint, 1, 1, 1)
    r = jnp.maximum(pooled + gg, 0.0)
    y = jnp.einsum("nfdhw,of->nodhw", r, params["wy"]) + params["by"][0, 0]
    s = 1.0 / (1.0 + jnp.exp(-y))                                        # (N,1,Dh,Hh,Wh)
    up = jnp.einsum("nxabc,da,hb,wc->nxdhw", s, Ud, Uh, Uw)
    att = up * xl
    z = jnp.einsum("ncdhw,oc->nodhw", att, params["wout"]) + params["bout"].reshape(1, Fl, 1, 1, 1)
    mean = z.mean(axis=(0, 2, 3, 4), keepdims=True)
    var = ((z - mean) ** 2).mean(axis=(0, 2, 3, 4), keepdims=True)
    out = (params["gamma"].reshape(1, Fl, 1, 1, 1) * (z - mean) * jax.lax.rsqrt(var + 1e-5)
           + params["beta"].reshape(1, Fl, 1, 1, 1))
    return out


if __name__ == "__main__":
    N, Fl, Fg, Fint = 2, 8, 8, 8
    D = H = W = 8
    Dh, Hh, Wh = D // 2, H // 2, W // 2

    key = jax.random.PRNGKey(0)
    ks = jax.random.split(key, 11)
    xl = jax.random.normal(ks[0], (N, Fl, D, H, W), jnp.float32)
    g = jax.random.normal(ks[1], (N, Fg, Dh, Hh, Wh), jnp.float32)

    params = dict(
        wx=jax.random.normal(ks[2], (Fint, Fl), jnp.float32) * 0.2,      # Wx conv (no bias)
        wg=jax.random.normal(ks[3], (Fint, Fg), jnp.float32) * 0.2,      # Wg conv
        bg=jax.random.normal(ks[4], (Fint, 1), jnp.float32) * 0.1,       # Wg bias
        wy=jax.random.normal(ks[5], (1, Fint), jnp.float32) * 0.2,       # y conv (1 out ch)
        by=jax.random.normal(ks[6], (1, 1), jnp.float32) * 0.1,          # y bias
        wout=jax.random.normal(ks[7], (Fl, Fl), jnp.float32) * 0.2,      # out conv
        bout=jax.random.normal(ks[8], (Fl, 1), jnp.float32) * 0.1,       # out bias
        gamma=jax.random.normal(ks[9], (Fl,), jnp.float32) * 0.1 + 1.0,  # BN weight
        beta=jax.random.normal(ks[10], (Fl,), jnp.float32) * 0.1,        # BN bias
    )

    fwd = jax.jit(functools.partial(grid_attention_gate_local3d,
                                    row_tile=2048, p_tile=2048))
    out = jax.block_until_ready(fwd(xl, g, params))

    ref = reference(xl, g, params,
                    jnp.asarray(_upsample_matrix_1d(Dh, D)),
                    jnp.asarray(_upsample_matrix_1d(Hh, H)),
                    jnp.asarray(_upsample_matrix_1d(Wh, W)))
    np.testing.assert_allclose(np.asarray(out), np.asarray(ref), rtol=1e-3, atol=1e-3)
    print("KERNEL_OK")
</pallas_src>

<mosaic_0001>
module attributes {stable_mosaic.version = 11 : i64} {
  func.func @gate_kernel(%arg0: i32, %arg1: i32, %arg2: memref<1x64x64xf32, #tpu.memory_space<vmem>>, %arg3: memref<1x8x64xf32, #tpu.memory_space<vmem>>, %arg4: memref<64x64xf32, #tpu.memory_space<vmem>>, %arg5: memref<8x8xf32, #tpu.memory_space<vmem>>, %arg6: memref<8x1xf32, #tpu.memory_space<vmem>>, %arg7: memref<1x8xf32, #tpu.memory_space<vmem>>, %arg8: memref<1x1xf32, #tpu.memory_space<smem>>, %arg9: memref<1x1x64xf32, #tpu.memory_space<vmem>>) attributes {dimension_semantics = [#tpu.dimension_semantics<parallel>, #tpu.dimension_semantics<parallel>], iteration_bounds = array<i64: 2, 1>, scalar_prefetch = 0 : i64, scratch_operands = 0 : i64, tpu.core_type = #tpu.core_type<tc>, window_params = [{transform_indices = @transform_0, window_bounds = array<i64: 1, 64, 64>}, {transform_indices = @transform_1, window_bounds = array<i64: 1, 8, 64>}, {pipeline_mode = #tpu.pipeline_mode<synchronous>, transform_indices = @transform_2, window_bounds = array<i64: 64, 64>}, {pipeline_mode = #tpu.pipeline_mode<synchronous>, transform_indices = @transform_3, window_bounds = array<i64: 8, 8>}, {pipeline_mode = #tpu.pipeline_mode<synchronous>, transform_indices = @transform_4, window_bounds = array<i64: 8, 1>}, {pipeline_mode = #tpu.pipeline_mode<synchronous>, transform_indices = @transform_5, window_bounds = array<i64: 1, 8>}, {transform_indices = @transform_6, window_bounds = array<i64: 1, 1>}, {transform_indices = @transform_7, window_bounds = array<i64: 1, 1, 64>}]} {
    %c0 = arith.constant 0 : index
    %c0_0 = arith.constant 0 : index
    %0 = vector.load %arg4[%c0, %c0_0] : memref<64x64xf32, #tpu.memory_space<vmem>>, vector<64x64xf32>
    %c0_1 = arith.constant 0 : index
    %c0_2 = arith.constant 0 : index
    %c0_3 = arith.constant 0 : index
    %1 = vector.load %arg2[%c0_1, %c0_2, %c0_3] : memref<1x64x64xf32, #tpu.memory_space<vmem>>, vector<1x64x64xf32>
    %2 = vector.shape_cast %1 : vector<1x64x64xf32> to vector<64x64xf32>
    %cst = arith.constant dense<0.000000e+00> : vector<64x64xf32>
    %3 = tpu.matmul %0, %2, %cst {dimension_numbers = #tpu.dot_dimension_numbers<[1], [0], [0], [1], [0, 0, 1, 1], [], []>} : vector<64x64xf32>, vector<64x64xf32>, vector<64x64xf32> -> vector<64x64xf32>
    %4 = vector.extract_strided_slice %3 {offsets = [0, 0], sizes = [8, 64], strides = [1, 1]} : vector<64x64xf32> to vector<8x64xf32>
    %5 = vector.extract_strided_slice %3 {offsets = [8, 0], sizes = [8, 64], strides = [1, 1]} : vector<64x64xf32> to vector<8x64xf32>
    %6 = arith.maximumf %4, %5 : vector<8x64xf32>
    %7 = vector.extract_strided_slice %3 {offsets = [16, 0], sizes = [8, 64], strides = [1, 1]} : vector<64x64xf32> to vector<8x64xf32>
    %8 = arith.maximumf %6, %7 : vector<8x64xf32>
    %9 = vector.extract_strided_slice %3 {offsets = [24, 0], sizes = [8, 64], strides = [1, 1]} : vector<64x64xf32> to vector<8x64xf32>
    %10 = arith.maximumf %8, %9 : vector<8x64xf32>
    %11 = vector.extract_strided_slice %3 {offsets = [32, 0], sizes = [8, 64], strides = [1, 1]} : vector<64x64xf32> to vector<8x64xf32>
    %12 = arith.maximumf %10, %11 : vector<8x64xf32>
    %13 = vector.extract_strided_slice %3 {offsets = [40, 0], sizes = [8, 64], strides = [1, 1]} : vector<64x64xf32> to vector<8x64xf32>
    %14 = arith.maximumf %12, %13 : vector<8x64xf32>
    %15 = vector.extract_strided_slice %3 {offsets = [48, 0], sizes = [8, 64], strides = [1, 1]} : vector<64x64xf32> to vector<8x64xf32>
    %16 = arith.maximumf %14, %15 : vector<8x64xf32>
    %17 = vector.extract_strided_slice %3 {offsets = [56, 0], sizes = [8, 64], strides = [1, 1]} : vector<64x64xf32> to vector<8x64xf32>
    %18 = arith.maximumf %16, %17 : vector<8x64xf32>
    %c0_4 = arith.constant 0 : index
    %c0_5 = arith.constant 0 : index
    %19 = vector.load %arg5[%c0_4, %c0_5] : memref<8x8xf32, #tpu.memory_space<vmem>>, vector<8x8xf32>
    %c0_6 = arith.constant 0 : index
    %c0_7 = arith.constant 0 : index
    %c0_8 = arith.constant 0 : index
    %20 = vector.load %arg3[%c0_6, %c0_7, %c0_8] : memref<1x8x64xf32, #tpu.memory_space<vmem>>, vector<1x8x64xf32>
    %21 = vector.shape_cast %20 : vector<1x8x64xf32> to vector<8x64xf32>
    %cst_9 = arith.constant dense<0.000000e+00> : vector<8x64xf32>
    %22 = tpu.matmul %19, %21, %cst_9 {dimension_numbers = #tpu.dot_dimension_numbers<[1], [0], [0], [1], [0, 0, 1, 1], [], []>} : vector<8x8xf32>, vector<8x64xf32>, vector<8x64xf32> -> vector<8x64xf32>
    %c0_10 = arith.constant 0 : index
    %c0_11 = arith.constant 0 : index
    %23 = vector.load %arg6[%c0_10, %c0_11] : memref<8x1xf32, #tpu.memory_space<vmem>>, vector<8x1xf32>
    %24 = vector.broadcast %23 : vector<8x1xf32> to vector<8x64xf32>
    %25 = arith.addf %22, %24 : vector<8x64xf32>
    %26 = arith.addf %18, %25 : vector<8x64xf32>
    %cst_12 = arith.constant 0.000000e+00 : f32
    %27 = vector.broadcast %cst_12 : f32 to vector<8x64xf32>
    %28 = arith.maximumf %26, %27 : vector<8x64xf32>
    %c0_13 = arith.constant 0 : index
    %c0_14 = arith.constant 0 : index
    %29 = vector.load %arg7[%c0_13, %c0_14] : memref<1x8xf32, #tpu.memory_space<vmem>>, vector<1x8xf32>
    %cst_15 = arith.constant dense<0.000000e+00> : vector<1x64xf32>
    %30 = tpu.matmul %29, %28, %cst_15 {dimension_numbers = #tpu.dot_dimension_numbers<[1], [0], [0], [1], [0, 0, 1, 1], [], []>} : vector<1x8xf32>, vector<8x64xf32>, vector<1x64xf32> -> vector<1x64xf32>
    %c0_16 = arith.constant 0 : index
    %c0_17 = arith.constant 0 : index
    %31 = memref.load %arg8[%c0_16, %c0_17] : memref<1x1xf32, #tpu.memory_space<smem>>
    %32 = vector.broadcast %31 : f32 to vector<1x64xf32>
    %33 = arith.addf %30, %32 : vector<1x64xf32>
    %cst_18 = arith.constant 0.000000e+00 : f32
    %34 = vector.broadcast %cst_18 : f32 to vector<1x64xf32>
    %35 = arith.subf %34, %33 : vector<1x64xf32>
    %36 = math.exp %35 : vector<1x64xf32>
    %cst_19 = arith.constant 1.000000e+00 : f32
    %37 = vector.broadcast %cst_19 : f32 to vector<1x64xf32>
    %38 = arith.addf %37, %36 : vector<1x64xf32>
    %cst_20 = arith.constant 1.000000e+00 : f32
    %39 = vector.broadcast %cst_20 : f32 to vector<1x64xf32>
    %40 = arith.divf %39, %38 : vector<1x64xf32>
    %c0_21 = arith.constant 0 : index
    %c0_22 = arith.constant 0 : index
    %c0_23 = arith.constant 0 : index
    %41 = vector.load %arg9[%c0_21, %c0_22, %c0_23] : memref<1x1x64xf32, #tpu.memory_space<vmem>>, vector<1x1x64xf32>
    %42 = vector.shape_cast %41 : vector<1x1x64xf32> to vector<1x64xf32>
    %43 = vector.shape_cast %40 : vector<1x64xf32> to vector<1x1x64xf32>
    tpu.vector_store %arg9[%c0_21, %c0_22, %c0_23], %43 {strides = array<i32>} : memref<1x1x64xf32, #tpu.memory_space<vmem>>, vector<1x1x64xf32>,
    return
  }
  func.func @transform_0(%arg0: i32, %arg1: i32) -> (i32, i32, i32) {
    %c0_i32 = arith.constant 0 : i32
    %c0_i32_0 = arith.constant 0 : i32
    return %arg0, %c0_i32, %arg1 : i32, i32, i32
  }
  func.func @transform_1(%arg0: i32, %arg1: i32) -> (i32, i32, i32) {
    %c0_i32 = arith.constant 0 : i32
    %c0_i32_0 = arith.constant 0 : i32
    return %arg0, %c0_i32, %arg1 : i32, i32, i32
  }
  func.func @transform_2(%arg0: i32, %arg1: i32) -> (i32, i32) {
    %c0_i32 = arith.constant 0 : i32
    %c0_i32_0 = arith.constant 0 : i32
    %c0_i32_1 = arith.constant 0 : i32
    return %c0_i32, %c0_i32_0 : i32, i32
  }
  func.func @transform_3(%arg0: i32, %arg1: i32) -> (i32, i32) {
    %c0_i32 = arith.constant 0 : i32
    %c0_i32_0 = arith.constant 0 : i32
    %c0_i32_1 = arith.constant 0 : i32
    return %c0_i32, %c0_i32_0 : i32, i32
  }
  func.func @transform_4(%arg0: i32, %arg1: i32) -> (i32, i32) {
    %c0_i32 = arith.constant 0 : i32
    %c0_i32_0 = arith.constant 0 : i32
    %c0_i32_1 = arith.constant 0 : i32
    return %c0_i32, %c0_i32_0 : i32, i32
  }
  func.func @transform_5(%arg0: i32, %arg1: i32) -> (i32, i32) {
    %c0_i32 = arith.constant 0 : i32
    %c0_i32_0 = arith.constant 0 : i32
    %c0_i32_1 = arith.constant 0 : i32
    return %c0_i32, %c0_i32_0 : i32, i32
  }
  func.func @transform_6(%arg0: i32, %arg1: i32) -> (i32, i32) {
    %c0_i32 = arith.constant 0 : i32
    %c0_i32_0 = arith.constant 0 : i32
    %c0_i32_1 = arith.constant 0 : i32
    return %c0_i32, %c0_i32_0 : i32, i32
  }
  func.func @transform_7(%arg0: i32, %arg1: i32) -> (i32, i32, i32) {
    %c0_i32 = arith.constant 0 : i32
    %c0_i32_0 = arith.constant 0 : i32
    return %arg0, %c0_i32, %arg1 : i32, i32, i32
  }
}

module attributes {stable_mosaic.version = 11 : i64} {
  func.func @stats_kernel(%arg0: i32, %arg1: i32, %arg2: memref<1x1x512xf32, #tpu.memory_space<vmem>>, %arg3: memref<1x8x512xf32, #tpu.memory_space<vmem>>, %arg4: memref<1x1x8x1xf32, #tpu.memory_space<vmem>>, %arg5: memref<1x1x8x8xf32, #tpu.memory_space<vmem>>) attributes {dimension_semantics = [#tpu.dimension_semantics<parallel>, #tpu.dimension_semantics<parallel>], iteration_bounds = array<i64: 2, 1>, scalar_prefetch = 0 : i64, scratch_operands = 0 : i64, tpu.core_type = #tpu.core_type<tc>, window_params = [{transform_indices = @transform_0, window_bounds = array<i64: 1, 1, 512>}, {transform_indices = @transform_1, window_bounds = array<i64: 1, 8, 512>}, {transform_indices = @transform_2, window_bounds = array<i64: 1, 1, 8, 1>}, {transform_indices = @transform_3, window_bounds = array<i64: 1, 1, 8, 8>}]} {
    %c0 = arith.constant 0 : index
    %c0_0 = arith.constant 0 : index
    %c0_1 = arith.constant 0 : index
    %0 = vector.load %arg2[%c0, %c0_0, %c0_1] : memref<1x1x512xf32, #tpu.memory_space<vmem>>, vector<1x1x512xf32>
    %1 = vector.shape_cast %0 : vector<1x1x512xf32> to vector<1x512xf32>
    %c0_2 = arith.constant 0 : index
    %c0_3 = arith.constant 0 : index
    %c0_4 = arith.constant 0 : index
    %2 = vector.load %arg3[%c0_2, %c0_3, %c0_4] : memref<1x8x512xf32, #tpu.memory_space<vmem>>, vector<1x8x512xf32>
    %3 = vector.shape_cast %2 : vector<1x8x512xf32> to vector<8x512xf32>
    %4 = vector.broadcast %1 : vector<1x512xf32> to vector<8x512xf32>
    %5 = arith.mulf %4, %3 : vector<8x512xf32>
    %cst = arith.constant dense<0.000000e+00> : vector<8xf32>
    %6 = vector.multi_reduction <add>, %5, %cst [1] : vector<8x512xf32> to vector<8xf32>
    %7 = vector.shape_cast %6 : vector<8xf32> to vector<8x1xf32>
    %c0_5 = arith.constant 0 : index
    %c0_6 = arith.constant 0 : index
    %c0_7 = arith.constant 0 : index
    %c0_8 = arith.constant 0 : index
    %8 = vector.load %arg4[%c0_5, %c0_6, %c0_7, %c0_8] : memref<1x1x8x1xf32, #tpu.memory_space<vmem>>, vector<1x1x8x1xf32>
    %9 = vector.shape_cast %8 : vector<1x1x8x1xf32> to vector<8x1xf32>
    %10 = vector.shape_cast %7 : vector<8x1xf32> to vector<1x1x8x1xf32>
    tpu.vector_store %arg4[%c0_5, %c0_6, %c0_7, %c0_8], %10 {strides = array<i32>} : memref<1x1x8x1xf32, #tpu.memory_space<vmem>>, vector<1x1x8x1xf32>,
    %cst_9 = arith.constant dense<0.000000e+00> : vector<8x8xf32>
    %11 = tpu.matmul %5, %5, %cst_9 {dimension_numbers = #tpu.dot_dimension_numbers<[1], [1], [0], [0], [0, 0, 1, 0], [], []>} : vector<8x512xf32>, vector<8x512xf32>, vector<8x8xf32> -> vector<8x8xf32>
    %c0_10 = arith.constant 0 : index
    %c0_11 = arith.constant 0 : index
    %c0_12 = arith.constant 0 : index
    %c0_13 = arith.constant 0 : index
    %12 = vector.load %arg5[%c0_10, %c0_11, %c0_12, %c0_13] : memref<1x1x8x8xf32, #tpu.memory_space<vmem>>, vector<1x1x8x8xf32>
    %13 = vector.shape_cast %12 : vector<1x1x8x8xf32> to vector<8x8xf32>
    %14 = vector.shape_cast %11 : vector<8x8xf32> to vector<1x1x8x8xf32>
    tpu.vector_store %arg5[%c0_10, %c0_11, %c0_12, %c0_13], %14 {strides = array<i32>} : memref<1x1x8x8xf32, #tpu.memory_space<vmem>>, vector<1x1x8x8xf32>,
    return
  }
  func.func @transform_0(%arg0: i32, %arg1: i32) -> (i32, i32, i32) {
    %c0_i32 = arith.constant 0 : i32
    %c0_i32_0 = arith.constant 0 : i32
    return %arg0, %c0_i32, %arg1 : i32, i32, i32
  }
  func.func @transform_1(%arg0: i32, %arg1: i32) -> (i32, i32, i32) {
    %c0_i32 = arith.constant 0 : i32
    %c0_i32_0 = arith.constant 0 : i32
    return %arg0, %c0_i32, %arg1 : i32, i32, i32
  }
  func.func @transform_2(%arg0: i32, %arg1: i32) -> (i32, i32, i32, i32) {
    %c0_i32 = arith.constant 0 : i32
    %c0_i32_0 = arith.constant 0 : i32
    %c0_i32_1 = arith.constant 0 : i32
    return %arg0, %arg1, %c0_i32, %c0_i32_0 : i32, i32, i32, i32
  }
  func.func @transform_3(%arg0: i32, %arg1: i32) -> (i32, i32, i32, i32) {
    %c0_i32 = arith.constant 0 : i32
    %c0_i32_0 = arith.constant 0 : i32
    %c0_i32_1 = arith.constant 0 : i32
    return %arg0, %arg1, %c0_i32, %c0_i32_0 : i32, i32, i32, i32
  }
}

module attributes {stable_mosaic.version = 11 : i64} {
  func.func @out_kernel(%arg0: i32, %arg1: i32, %arg2: memref<1x1x512xf32, #tpu.memory_space<vmem>>, %arg3: memref<1x8x512xf32, #tpu.memory_space<vmem>>, %arg4: memref<8x8xf32, #tpu.memory_space<vmem>>, %arg5: memref<8x1xf32, #tpu.memory_space<vmem>>, %arg6: memref<1x8x512xf32, #tpu.memory_space<vmem>>) attributes {dimension_semantics = [#tpu.dimension_semantics<parallel>, #tpu.dimension_semantics<parallel>], iteration_bounds = array<i64: 2, 1>, scalar_prefetch = 0 : i64, scratch_operands = 0 : i64, tpu.core_type = #tpu.core_type<tc>, window_params = [{transform_indices = @transform_0, window_bounds = array<i64: 1, 1, 512>}, {transform_indices = @transform_1, window_bounds = array<i64: 1, 8, 512>}, {pipeline_mode = #tpu.pipeline_mode<synchronous>, transform_indices = @transform_2, window_bounds = array<i64: 8, 8>}, {pipeline_mode = #tpu.pipeline_mode<synchronous>, transform_indices = @transform_3, window_bounds = array<i64: 8, 1>}, {transform_indices = @transform_4, window_bounds = array<i64: 1, 8, 512>}]} {
    %c0 = arith.constant 0 : index
    %c0_0 = arith.constant 0 : index
    %c0_1 = arith.constant 0 : index
    %0 = vector.load %arg2[%c0, %c0_0, %c0_1] : memref<1x1x512xf32, #tpu.memory_space<vmem>>, vector<1x1x512xf32>
    %1 = vector.shape_cast %0 : vector<1x1x512xf32> to vector<1x512xf32>
    %c0_2 = arith.constant 0 : index
    %c0_3 = arith.constant 0 : index
    %c0_4 = arith.constant 0 : index
    %2 = vector.load %arg3[%c0_2, %c0_3, %c0_4] : memref<1x8x512xf32, #tpu.memory_space<vmem>>, vector<1x8x512xf32>
    %3 = vector.shape_cast %2 : vector<1x8x512xf32> to vector<8x512xf32>
    %4 = vector.broadcast %1 : vector<1x512xf32> to vector<8x512xf32>
    %5 = arith.mulf %4, %3 : vector<8x512xf32>
    %c0_5 = arith.constant 0 : index
    %c0_6 = arith.constant 0 : index
    %6 = vector.load %arg4[%c0_5, %c0_6] : memref<8x8xf32, #tpu.memory_space<vmem>>, vector<8x8xf32>
    %cst = arith.constant dense<0.000000e+00> : vector<8x512xf32>
    %7 = tpu.matmul %6, %5, %cst {dimension_numbers = #tpu.dot_dimension_numbers<[1], [0], [0], [1], [0, 0, 1, 1], [], []>} : vector<8x8xf32>, vector<8x512xf32>, vector<8x512xf32> -> vector<8x512xf32>
    %c0_7 = arith.constant 0 : index
    %c0_8 = arith.constant 0 : index
    %8 = vector.load %arg5[%c0_7, %c0_8] : memref<8x1xf32, #tpu.memory_space<vmem>>, vector<8x1xf32>
    %9 = vector.broadcast %8 : vector<8x1xf32> to vector<8x512xf32>
    %10 = arith.addf %7, %9 : vector<8x512xf32>
    %c0_9 = arith.constant 0 : index
    %c0_10 = arith.constant 0 : index
    %c0_11 = arith.constant 0 : index
    %11 = vector.load %arg6[%c0_9, %c0_10, %c0_11] : memref<1x8x512xf32, #tpu.memory_space<vmem>>, vector<1x8x512xf32>
    %12 = vector.shape_cast %11 : vector<1x8x512xf32> to vector<8x512xf32>
    %13 = vector.shape_cast %10 : vector<8x512xf32> to vector<1x8x512xf32>
    tpu.vector_store %arg6[%c0_9, %c0_10, %c0_11], %13 {strides = array<i32>} : memref<1x8x512xf32, #tpu.memory_space<vmem>>, vector<1x8x512xf32>,
    return
  }
  func.func @transform_0(%arg0: i32, %arg1: i32) -> (i32, i32, i32) {
    %c0_i32 = arith.constant 0 : i32
    %c0_i32_0 = arith.constant 0 : i32
    return %arg0, %c0_i32, %arg1 : i32, i32, i32
  }
  func.func @transform_1(%arg0: i32, %arg1: i32) -> (i32, i32, i32) {
    %c0_i32 = arith.constant 0 : i32
    %c0_i32_0 = arith.constant 0 : i32
    return %arg0, %c0_i32, %arg1 : i32, i32, i32
  }
  func.func @transform_2(%arg0: i32, %arg1: i32) -> (i32, i32) {
    %c0_i32 = arith.constant 0 : i32
    %c0_i32_0 = arith.constant 0 : i32
    %c0_i32_1 = arith.constant 0 : i32
    return %c0_i32, %c0_i32_0 : i32, i32
  }
  func.func @transform_3(%arg0: i32, %arg1: i32) -> (i32, i32) {
    %c0_i32 = arith.constant 0 : i32
    %c0_i32_0 = arith.constant 0 : i32
    %c0_i32_1 = arith.constant 0 : i32
    return %c0_i32, %c0_i32_0 : i32, i32
  }
  func.func @transform_4(%arg0: i32, %arg1: i32) -> (i32, i32, i32) {
    %c0_i32 = arith.constant 0 : i32
    %c0_i32_0 = arith.constant 0 : i32
    return %arg0, %c0_i32, %arg1 : i32, i32, i32
  }
}

</mosaic_0001>

<bundles_post_ra>
// kernel: grid_attention_gate_local3d.3
= control target key start
LH: loop header
LB: loop body
LE: loop exit
PB: predicated region body
PF: predicated region fallthrough
CT: control target
= control target key end

     0   :  { %s947_s26 = smov 0   ;;  %s949_s27 = smov 0   ;;  %s1031_s0 = inlined_call_operand.vmem [shape: f32[2,64,64], index: 0, kind: input, shape index: {}]   ;;  %s1032_s1 = inlined_call_operand.vmem [shape: f32[2,8,64], index: 1, kind: input, shape index: {}]   ;;  %s1033_s2 = inlined_call_operand.vmem [shape: f32[64,64], index: 2, kind: input, shape index: {}]   ;;  %s1034_s3 = inlined_call_operand.vmem [shape: f32[8,8], index: 3, kind: input, shape index: {}]   ;;  %s1035_s4 = inlined_call_operand.vmem [shape: f32[8,1], index: 4, kind: input, shape index: {}]   ;;  %s1036_s5 = inlined_call_operand.vmem [shape: f32[1,8], index: 5, kind: input, shape index: {}]   ;;  %s1037_s6 = inlined_call_operand.<no memory space> [shape: f32[1,1], index: 6, kind: input, shape index: {}]   ;;  %s1038_s7 = inlined_call_operand.vmem [shape: f32[2,1,64], index: 7, kind: output, shape index: {}]  }
   0x1   :  { %12 = sst [smem:[#allocation2]] %s1037_s6  ;;  %s951_s28 = smov 0  }
   0x2 LB: > { %s30_s6 = sadd.s32 1, %s895_s27  ;;  %p746_p0 = scmp.ge.s32.totalorder %s899_s28, 1  ;;  %s899_s28 = sphi %s951_s28, %s18_s28   ;;  %s895_s27 = sphi %s949_s27, %s1040_s27   ;;  %s891_s26 = sphi %s947_s26, %s1039_s26  }
   0x3   : > { %p32_p1 = scmp.ge.s32.totalorder %s30_s6, 2  ;;  %p271_p2 = scmp.lt.s32.totalorder %s899_s28, 3 }
   0x5   : > { %s1042_s6 = smov (%p32_p1, %s30_s6), 0  ;;  %p272_p3 = pnand %p746_p0, %p271_p2 }
   0x6   : > { %p314_p4 = scmp.lt.s32.totalorder (!%p272_p3), %s891_s26, 1  ;;  %v335_v0 = vld [vmem:[%s1033_s2] sm:$0xff] (!%p272_p3)  ;;  %vm351_vm0 = vcmask (!%p272_p3), 523264   ;;  %v341_v1 = vld [vmem:[%s1033_s2 + $0x30] sm:$0xff] (!%p272_p3)  ;;  %v901_v2 = vmov (!%p272_p3), 0   ;;  %v336_v16 = vld [vmem:[%s1033_s2 + $0x8] sm:$0xff] (!%p272_p3) }
   0x7   : > { %275 = sbr.rel (%p272_p3) target bundleno = 513 (0x201), region = 48  ;;  %799 = vmatprep.mubr.msk.f32.mxu0 (!%p272_p3), %vm351_vm0, %v335_v0  ;;  %872 = vset.pattern.permute.xlu0 (!%p272_p3), %v901_v2  ;;  %v490_v3 = vld [vmem:[%s1035_s4] sm:$0xff] (!%p272_p3)  ;;  %v342_v17 = vld [vmem:[%s1033_s2 + $0x38] sm:$0xff] (!%p272_p3)  ;;  %v337_v18 = vld [vmem:[%s1033_s2 + $0x10] sm:$0xff] (!%p272_p3)  ;;  %v902_v19 = vmov (!%p272_p3), 0.0   ;;  %vm496_vm1 = vcmask (!%p272_p3), 64512  }
   0x8   : > { %808 = vmatprep.mubr.msk.f32.mxu1 (!%p272_p3), %vm351_vm0, %v341_v1  ;;  %493 = vperm.xlu0 (!%p272_p3), %872, %v490_v3   ;;  %v338_v21 = vld [vmem:[%s1033_s2 + $0x18] sm:$0xff] (!%p272_p3)  ;;  %v488_v22 = vld [vmem:[%s1034_s3] sm:$0xff] (!%p272_p3)  ;;  %vm903_vm2 = vmmov (!%p272_p3), 0   ;;  %v340_v24 = vld [vmem:[%s1033_s2 + $0x28] sm:$0xff] (!%p272_p3)  ;;  %vm654_vm3 = vcmask (!%p272_p3), 516096  }
   0x9   : > { %v339_v23 = vld [vmem:[%s1033_s2 + $0x20] sm:$0xff] (!%p272_p3) }
   0xa   : > { %v572_v46 = vld [vmem:[%s1036_s5] sm:$0x1] (!%p272_p3) }
   0xe   : > { %s1044_s26 = smov (!%p314_p4, %s891_s26), 1 }
   0xf   : > { %s762_s12 = sshll.u32 %s1044_s26, 6  ;;  %s749_s16 = sshll.u32 %s1044_s26, 3 }
  0x10   : > { %s321_s15 = scalar_lea.vmem %s1031_s0, %s762_s12  ;;  %s328_s19 = scalar_lea.vmem %s1032_s1, %s749_s16 }
  0x11   : > { %v343_v4 = vld [vmem:[%s321_s15] sm:$0xff]  ;;  %v344_v5 = vld [vmem:[%s321_s15 + $0x8] sm:$0xff]  ;;  %v345_v6 = vld [vmem:[%s321_s15 + $0x10] sm:$0xff]  ;;  %s573_s16 = sld [smem:[#allocation2]] }
  0x12   : > { %v821_v7 = vpack.c.bf16 %v344_v5, %v343_v4  ;;  %v346_v8 = vld [vmem:[%s321_s15 + $0x18] sm:$0xff]  ;;  %v347_v10 = vld [vmem:[%s321_s15 + $0x20] sm:$0xff]  ;;  %v348_v11 = vld [vmem:[%s321_s15 + $0x28] sm:$0xff] }
  0x13   : > { %v825_v9 = vpack.c.bf16 %v346_v8, %v345_v6  ;;  %v829_v12 = vpack.c.bf16 %v348_v11, %v347_v10  ;;  %v349_v13 = vld [vmem:[%s321_s15 + $0x30] sm:$0xff]  ;;  %v350_v14 = vld [vmem:[%s321_s15 + $0x38] sm:$0xff]  ;;  %v489_v20 = vld [vmem:[%s328_s19] sm:$0xff]  ;;  %s334_s19 = scalar_lea.vmem %s1038_s7, %s1044_s26 }
  0x14   : > { %822 = vmatprep.subr.bf16.mxu0 %v821_v7  ;;  %837 = vmatprep.subr.bf16.mxu1 %v821_v7  ;;  %v833_v15 = vpack.c.bf16 %v350_v14, %v349_v13 }
  0x15   : > { %824 = vmatpush3.bf16.msra.mxu0 %v821_v7  ;;  %841 = vmatpush3.bf16.msra.mxu1 %v821_v7 }
  0x16   : > { %826 = vmatprep.subr.bf16.mxu0 %v825_v9  ;;  %838 = vmatprep.subr.bf16.mxu1 %v825_v9 }
  0x17   : > { %v574_v47 = vstv %s573_s16 }
  0x19   : > { %828 = vmatpush3.bf16.msra.mxu0 %v825_v9  ;;  %842 = vmatpush3.bf16.msra.mxu1 %v825_v9 }
  0x1a   : > { %830 = vmatprep.subr.bf16.mxu0 %v829_v12  ;;  %839 = vmatprep.subr.bf16.mxu1 %v829_v12 }
  0x1d   : > { %832 = vmatpush3.bf16.msra.mxu0 %v829_v12  ;;  %843 = vmatpush3.bf16.msra.mxu1 %v829_v12 }
  0x1e   : > { %834 = vmatprep.subr.bf16.mxu0 %v833_v15  ;;  %840 = vmatprep.subr.bf16.mxu1 %v833_v15 }
  0x21   : > { %836 = vmatpush3.bf16.msra.mxu0 %v833_v15  ;;  %844 = vmatpush3.bf16.msra.mxu1 %v833_v15 }
  0x22   : > { %811 = vmatprep.subr.mxu1 %v902_v19 }
  0x24   : > { %800 = vmatmul.mubr.msk.f32.vlgmr.msra.gmra.mrb[0].mxu0 %vm351_vm0, %v336_v16  ;;  %809 = vmatmul.mubr.msk.f32.vlgmr.msra.gmra.mrb[0].mxu1 %vm351_vm0, %v342_v17 }
  0x25   : > { %802 = vmatprep.mubr.msk.f32.mxu0 %vm351_vm0, %v337_v18  ;;  %812 = vmatpush3.msra.mxu1 %v489_v20 }
  0x26   : > { %813 = vmatprep.mubr.msk.f32.mxu1 %vm903_vm2, %v902_v19  ;;  %816 = vmatprep.subr.mxu1 %v902_v19 }
  0x28   : > { %803 = vmatmul.mubr.msk.f32.gmra.mrb[2].mxu0 %vm351_vm0, %v338_v21  ;;  %814 = vmatmul.mubr.msk.f32.vlgmr.msra.gmra.mrb[2].mxu1 %vm496_vm1, %v488_v22 }
  0x29   : > { %805 = vmatprep.mubr.msk.f32.mxu0 %vm351_vm0, %v339_v23  ;;  %818 = vmatprep.mubr.msk.f32.mxu1 %vm903_vm2, %v902_v19 }
  0x2c   : > { %806 = vmatmul.mubr.msk.f32.gmra.mrb[4].mxu0 %vm351_vm0, %v340_v24 }
  0x87   : > { %v494_v39 = vpop.permute.xlu0 %493 }
  0xf7   : > { %v801_v25 = vpop.f32.mrb[0].mxu0  ;;  %v810_v26 = vpop.f32.mrb[0].mxu1 }
  0xf8   : > { %v442_v27 = vpop.f32.mrb[1].mxu0  ;;  %v472_v28 = vpop.f32.mrb[1].mxu1 }
  0xf9   : > { %v481_v29 = vmax.f32 %v442_v27, %v801_v25 }
  0xfb   : > { %v804_v30 = vpop.f32.mrb[2].mxu0  ;;  %v566_v31 = vpop.f32.mrb[2].mxu1 }
  0xfc   : > { %v452_v32 = vpop.f32.mrb[3].mxu0  ;;  %v815_v33 = vpop.f32.mrb[3].mxu1  ;;  %v567_v42 = vadd.f32 %v566_v31, %v494_v39 }
  0xfd   : > { %v482_v34 = vmax.f32 %v481_v29, %v452_v32 }
  0xff   : > { %v807_v35 = vpop.f32.mrb[4].mxu0  ;;  %v483_v36 = vmax.f32 %v482_v34, %v804_v30 }
 0x100   : > { %v462_v37 = vpop.f32.mrb[5].mxu0 }
 0x101   : > { %v484_v38 = vmax.f32 %v483_v36, %v462_v37 }
 0x103   : > { %v485_v40 = vmax.f32 %v484_v38, %v807_v35 }
 0x105   : > { %v486_v41 = vmax.f32 %v485_v40, %v472_v28 }
 0x107   : > { %v487_v43 = vmax.f32 %v486_v41, %v810_v26 }
 0x109   : > { %v570_v44 = vadd.f32 %v567_v42, %v487_v43 }
 0x10b   : > { %v571_v45 = vmax.f32 %v570_v44, 0.0 }
 0x10d   : > { %817 = vmatpush3.msra.mxu1 %v571_v45 }
 0x10e   : > { %819 = vmatmul.mubr.msk.f32.vlgmr.msra.gmra.mrb[4].mxu1 %vm496_vm1, %v572_v46 }
 0x1e1   : > { %v644_v48 = vpop.f32.mrb[4].mxu1 }
 0x1e2   : > { %v645_v49 = vadd.f32 %v644_v48, %v574_v47  ;;  %v820_v50 = vpop.f32.mrb[5].mxu1 }
 0x1e4   : > { %v648_v51 = vsub.f32 0.0, %v645_v49 }
 0x1e6   : > { %v649_v52 = vmul.f32 1.442695, %v648_v51 }
 0x1e8   : > { %873 = vpow2.f32 %v649_v52 }
 0x1f2   : > { %v874_v53 = vpop.eup %873 }
 0x1f3   : > { %v651_v54 = vadd.f32 1.0, %v874_v53 }
 0x1f5   : > { %875 = vrcp.f32 %v651_v54 }
 0x1ff   : > { %v876_v55 = vpop.eup %875 }
 0x200   : > { %655 = vst.msk [vmem:[%s334_s19] sm:$0x1] %vm654_vm3, %v876_v55 }
 0x201 PF: > { %s18_s28 = sadd.s32 1, %s899_s28   ;;  %s1039_s26 = smov %s895_s27 }
 0x202   : > { %p15_p5 = scmp.ge.s32.totalorder %s18_s28, 4   ;;  %s1040_s27 = smov %s1042_s6 }
 0x204   :  { %17 = sbr.rel (!%p15_p5) target bundleno = 2 (0x2), region = 81 }

// kernel: grid_attention_gate_local3d.4
= control target key start
LH: loop header
LB: loop body
LE: loop exit
PB: predicated region body
PF: predicated region fallthrough
CT: control target
= control target key end

     0   :  { %s651_s12 = smov 0   ;;  %s653_s13 = smov 0   ;;  %s695_s0 = inlined_call_operand.vmem [shape: f32[2,1,512], index: 0, kind: input, shape index: {}]   ;;  %s696_s1 = inlined_call_operand.vmem [shape: f32[2,8,512], index: 1, kind: input, shape index: {}]   ;;  %s697_s2 = inlined_call_operand.vmem [shape: f32[2,1,8,1], index: 2, kind: output, shape index: {0}]   ;;  %s698_s3 = inlined_call_operand.vmem [shape: f32[2,1,8,8], index: 3, kind: output, shape index: {1}]  }
   0x1   :  { %s655_s14 = smov 0  }
   0x2 LB: > { %s26_s15 = sadd.s32 1, %s625_s13  ;;  %p573_p0 = scmp.ge.s32.totalorder %s629_s14, 1  ;;  %s629_s14 = sphi %s655_s14, %s14_s14   ;;  %s625_s13 = sphi %s653_s13, %s700_s13   ;;  %s621_s12 = sphi %s651_s12, %s699_s12  }
   0x3   : > { %p28_p1 = scmp.ge.s32.totalorder %s26_s15, 2  ;;  %p179_p2 = scmp.lt.s32.totalorder %s629_s14, 3 }
   0x5   : > { %s702_s15 = smov (%p28_p1, %s26_s15), 0  ;;  %p180_p3 = pnand %p573_p0, %p179_p2 }
   0x6   : > { %p225_p4 = scmp.lt.s32.totalorder (!%p180_p3), %s621_s12, 1  ;;  %v263_v0 = vlaneseq (!%p180_p3)  ;;  %vm292_vm0 = vcmask (!%p180_p3), 7168   ;;  %vm434_vm1 = vcmask (!%p180_p3), 64512  }
   0x7   : > { %183 = sbr.rel (%p180_p3) target bundleno = 241 (0xf1), region = 28 }
   0x8   : > { %v264_v1 = vshrl.u32 (!%p180_p3), %v263_v0, 7 }
   0xa   : > { %v269_v2 = vsub.s32 (!%p180_p3), 1, %v264_v1  ;;  %v277_v3 = vsub.s32 (!%p180_p3), 3, %v264_v1  ;;  %v265_v4 = vsub.s32 (!%p180_p3), 0, %v264_v1  ;;  %v273_v5 = vsub.s32 (!%p180_p3), 2, %v264_v1 }
   0xe   : > { %s704_s12 = smov (!%p225_p4, %s621_s12), 1 }
   0xf   : > { %s574_s16 = sshll.u32 %s704_s12, 2  ;;  %s581_s17 = sshll.u32 %s704_s12, 5 }
  0x10   : > { %s231_s20 = scalar_lea.vmem %s695_s0, %s574_s16  ;;  %s241_s23 = scalar_lea.vmem %s696_s1, %s581_s17 }
  0x11   : > { %v257_v6 = vld [vmem:[%s231_s20] sm:$0xf]  ;;  %v259_v7 = vld [vmem:[%s241_s23 + $0x8] sm:$0xff]  ;;  %v261_v8 = vld [vmem:[%s241_s23 + $0x18] sm:$0xff]  ;;  %s577_s24 = sshll.u32 %s704_s12, 3 }
  0x12   : > { %v270_v9 = vrot.slane %v257_v6, %v269_v2  ;;  %v278_v10 = vrot.slane %v257_v6, %v277_v3  ;;  %v258_v11 = vld [vmem:[%s241_s23] sm:$0xff]  ;;  %v266_v12 = vrot.slane %v257_v6, %v265_v4  ;;  %v260_v13 = vld [vmem:[%s241_s23 + $0x10] sm:$0xff]  ;;  %v274_v14 = vrot.slane %v257_v6, %v273_v5  ;;  %s249_s27 = scalar_lea.vmem %s697_s2, %s577_s24  ;;  %s256_s30 = scalar_lea.vmem %s698_s3, %s577_s24 }
  0x14   : > { %v284_v15 = vmul.f32 %v270_v9, %v259_v7  ;;  %v286_v16 = vmul.f32 %v278_v10, %v261_v8  ;;  %v283_v17 = vmul.f32 %v266_v12, %v258_v11  ;;  %v285_v18 = vmul.f32 %v274_v14, %v260_v13 }
  0x16   : > { %294 = vmatprep.subr.mxu1 %v284_v15  ;;  %364 = vmatprep.subr.mxu0 %v286_v16  ;;  %v287_v19 = vadd.f32 %v284_v15, %v283_v17 }
  0x17   : > { %295 = vmatpush1.xpose.msra.mxu1 %v283_v17  ;;  %365 = vmatpush1.xpose.msra.mxu0 %v285_v18 }
  0x18   : > { %358 = vmatprep.mubr.f32.mxu1 %v284_v15  ;;  %428 = vmatprep.mubr.f32.mxu0 %v286_v16  ;;  %v288_v20 = vadd.f32 %v287_v19, %v285_v18 }
  0x1a   : > { %359 = vmatmul.mubr.f32.vlgmr.msra.gmra.mrb[0].mxu1 %v283_v17  ;;  %429 = vmatmul.mubr.f32.vlgmr.msra.gmra.mrb[0].mxu0 %v285_v18  ;;  %v289_v21 = vadd.f32 %v288_v20, %v286_v16 }
  0x1c   : > { %290 = vadd.xlane.f32.xlu0 %v289_v21 }
  0xa9   : > { %v291_v22 = vpop.xlane.xlu0 %290 }
  0xaa   : > { %293 = vst.msk [vmem:[%s249_s27] sm:$0xff] %vm292_vm0, %v291_v22 }
  0xed   : > { %v360_v23 = vpop.f32.mrb[0].mxu1  ;;  %v430_v24 = vpop.f32.mrb[0].mxu0 }
  0xee   : > { %v431_v25 = vadd.f32 %v430_v24, %v360_v23  ;;  %v362_v26 = vpop.f32.mrb[1].mxu1  ;;  %v432_v27 = vpop.f32.mrb[1].mxu0 }
  0xf0   : > { %435 = vst.msk [vmem:[%s256_s30] sm:$0xff] %vm434_vm1, %v431_v25 }
  0xf1 PF: > { %s14_s14 = sadd.s32 1, %s629_s14   ;;  %s699_s12 = smov %s625_s13 }
  0xf2   : > { %p11_p5 = scmp.ge.s32.totalorder %s14_s14, 4   ;;  %s700_s13 = smov %s702_s15 }
  0xf4   :  { %13 = sbr.rel (!%p11_p5) target bundleno = 2 (0x2), region = 73 }

// kernel: grid_attention_gate_local3d.5
= control target key start
LH: loop header
LB: loop body
LE: loop exit
PB: predicated region body
PF: predicated region fallthrough
CT: control target
= control target key end

     0   :  { %s653_s15 = smov 0   ;;  %s655_s16 = smov 0   ;;  %s703_s0 = inlined_call_operand.vmem [shape: f32[2,1,512], index: 0, kind: input, shape index: {}]   ;;  %s704_s1 = inlined_call_operand.vmem [shape: f32[2,8,512], index: 1, kind: input, shape index: {}]   ;;  %s705_s2 = inlined_call_operand.vmem [shape: f32[8,8], index: 2, kind: input, shape index: {}]   ;;  %s706_s3 = inlined_call_operand.vmem [shape: f32[8,1], index: 3, kind: input, shape index: {}]   ;;  %s707_s4 = inlined_call_operand.vmem [shape: f32[2,8,512], index: 4, kind: output, shape index: {}]  }
   0x1   :  { %s657_s17 = smov 0  }
   0x2 LB: > { %s26_s18 = sadd.s32 1, %s620_s16  ;;  %p563_p0 = scmp.ge.s32.totalorder %s624_s17, 1  ;;  %s624_s17 = sphi %s657_s17, %s14_s17   ;;  %s620_s16 = sphi %s655_s16, %s709_s16   ;;  %s616_s15 = sphi %s653_s15, %s708_s15  }
   0x3   : > { %p28_p1 = scmp.ge.s32.totalorder %s26_s18, 2  ;;  %p199_p2 = scmp.lt.s32.totalorder %s624_s17, 3 }
   0x5   : > { %s711_s18 = smov (%p28_p1, %s26_s18), 0  ;;  %p200_p3 = pnand %p563_p0, %p199_p2 }
   0x6   : > { %p242_p4 = scmp.lt.s32.totalorder (!%p200_p3), %s616_s15, 1  ;;  %v276_v0 = vlaneseq (!%p200_p3)  ;;  %v301_v1 = vld [vmem:[%s706_s3] sm:$0xff] (!%p200_p3)  ;;  %v626_v2 = vmov (!%p200_p3), 0.0   ;;  %v627_v4 = vmov (!%p200_p3), 0   ;;  %vm307_vm0 = vcmask (!%p200_p3), 64512  }
   0x7   : > { %203 = sbr.rel (%p200_p3) target bundleno = 240 (0xf0), region = 36  ;;  %375 = vmatprep.mubr.f32.mxu0 (!%p200_p3), %v626_v2  ;;  %446 = vmatprep.mubr.f32.mxu1 (!%p200_p3), %v626_v2  ;;  %v300_v22 = vld [vmem:[%s705_s2] sm:$0xff] (!%p200_p3) }
   0x8   : > { %v277_v3 = vshrl.u32 (!%p200_p3), %v276_v0, 7  ;;  %601 = vset.pattern.permute.xlu0 (!%p200_p3), %v627_v4 }
   0x9   : > { %304 = vperm.xlu0 (!%p200_p3), %601, %v301_v1  }
   0xa   : > { %v282_v5 = vsub.s32 (!%p200_p3), 1, %v277_v3  ;;  %v290_v6 = vsub.s32 (!%p200_p3), 3, %v277_v3  ;;  %v278_v7 = vsub.s32 (!%p200_p3), 0, %v277_v3  ;;  %v286_v8 = vsub.s32 (!%p200_p3), 2, %v277_v3 }
   0xe   : > { %s713_s15 = smov (!%p242_p4, %s616_s15), 1 }
   0xf   : > { %s564_s21 = sshll.u32 %s713_s15, 2  ;;  %s573_s22 = sshll.u32 %s713_s15, 5 }
  0x10   : > { %s248_s25 = scalar_lea.vmem %s703_s0, %s564_s21  ;;  %s258_s28 = scalar_lea.vmem %s704_s1, %s573_s22 }
  0x11   : > { %v270_v9 = vld [vmem:[%s248_s25] sm:$0xf]  ;;  %v272_v10 = vld [vmem:[%s258_s28 + $0x8] sm:$0xff]  ;;  %v274_v11 = vld [vmem:[%s258_s28 + $0x18] sm:$0xff]  ;;  %s268_s7 = scalar_lea.vmem %s707_s4, %s573_s22 }
  0x12   : > { %v283_v12 = vrot.slane %v270_v9, %v282_v5  ;;  %v291_v13 = vrot.slane %v270_v9, %v290_v6  ;;  %v271_v14 = vld [vmem:[%s258_s28] sm:$0xff]  ;;  %v279_v15 = vrot.slane %v270_v9, %v278_v7  ;;  %v273_v16 = vld [vmem:[%s258_s28 + $0x10] sm:$0xff]  ;;  %v287_v17 = vrot.slane %v270_v9, %v286_v8 }
  0x14   : > { %v297_v18 = vmul.f32 %v283_v12, %v272_v10  ;;  %v299_v19 = vmul.f32 %v291_v13, %v274_v11  ;;  %v296_v20 = vmul.f32 %v279_v15, %v271_v14  ;;  %v298_v21 = vmul.f32 %v287_v17, %v273_v16 }
  0x16   : > { %311 = vmatprep.subr.mxu0 %v297_v18  ;;  %382 = vmatprep.subr.mxu1 %v299_v19 }
  0x17   : > { %312 = vmatpush1.msra.mxu0 %v296_v20  ;;  %383 = vmatpush1.msra.mxu1 %v298_v21 }
  0x18   : > { %569 = vmatmul.mubr.msk.f32.vlgmr.msra.gmra.mrb[0].mxu0 %vm307_vm0, %v300_v22  ;;  %570 = vmatmul.mubr.msk.f32.vlgmr.msra.gmra.mrb[0].mxu1 %vm307_vm0, %v300_v22 }
  0x88   : > { %v305_v23 = vpop.permute.xlu0 %304 }
  0xeb   : > { %v377_v24 = vpop.f32.mrb[0].mxu0  ;;  %v448_v25 = vpop.f32.mrb[0].mxu1 }
  0xec   : > { %v378_v26 = vadd.f32 %v377_v24, %v305_v23  ;;  %v449_v27 = vadd.f32 %v448_v25, %v305_v23  ;;  %v379_v28 = vpop.f32.mrb[1].mxu0  ;;  %v450_v29 = vpop.f32.mrb[1].mxu1 }
  0xed   : > { %v380_v30 = vadd.f32 %v379_v28, %v305_v23  ;;  %v451_v31 = vadd.f32 %v450_v29, %v305_v23 }
  0xee   : > { %453 = vst [vmem:[%s268_s7] sm:$0xff] %v378_v26  ;;  %455 = vst [vmem:[%s268_s7 + $0x10] sm:$0xff] %v449_v27 }
  0xef   : > { %454 = vst [vmem:[%s268_s7 + $0x8] sm:$0xff] %v380_v30  ;;  %456 = vst [vmem:[%s268_s7 + $0x18] sm:$0xff] %v451_v31 }
  0xf0 PF: > { %s14_s17 = sadd.s32 1, %s624_s17   ;;  %s708_s15 = smov %s620_s16 }
  0xf1   : > { %p11_p5 = scmp.ge.s32.totalorder %s14_s17, 4   ;;  %s709_s16 = smov %s711_s18 }
  0xf3   :  { %13 = sbr.rel (!%p11_p5) target bundleno = 2 (0x2), region = 69 }

</bundles_post_ra>
